<compile_context>
chip_gen: v5e
topology: v5e:2x2
jax: 0.10.0
libtpu: 0.0.40
codegen_flags: <defaults>
</compile_context>

<pallas_src>
import jax
import jax.numpy as jnp
from jax import lax
from jax.experimental import pallas as pl
from jax.experimental.pallas import tpu as pltpu


def lexical_branch_kernel(ids_ref, emb_ref, wih_ref, whh_ref, bias_ref,
                          out_ref, gx_scr):
    TBp, _G4 = gx_scr.shape          # (T*Bp, 4H)
    Bp, H = out_ref.shape            # padded batch, hidden
    T = TBp // Bp
    V = emb_ref.shape[0]

    # ---- Input path, hoisted out of the recurrence -------------------------
    # Fuse embedding @ W_ih^T into a single (V, 4H) table on the MXU, then
    # gather per-token rows with a one-hot matmul and fold in the bias, all in
    # one shot for every timestep.
    # TODO(synk): for realistic vocab sizes keep the table in HBM (pl.ANY) and
    # replace the one-hot matmul with a scalar-prefetch / DMA row gather.
    wx_table = jnp.dot(emb_ref[...], wih_ref[...],
                       preferred_element_type=jnp.float32)          # (V, 4H)
    ids = ids_ref[...]                                              # (T*Bp, 1)
    iota = lax.broadcasted_iota(jnp.int32, (TBp, V), 1)             # (T*Bp, V)
    onehot = (iota == ids).astype(jnp.float32)
    gx_scr[...] = (jnp.dot(onehot, wx_table,
                           preferred_element_type=jnp.float32)
                   + bias_ref[...])                                 # (T*Bp, 4H)

    whh = whh_ref[...]                                              # (H, 4H)

    # ---- LSTM recurrence (h0 = c0 = 0, as in nn.LSTM default) --------------
    # h/c stay in vregs as loop carries; loop is fully unrolled (T is small
    # and static). Per-step reads are sublane-aligned because Bp % 8 == 0.
    def step(t, carry):
        h, c = carry
        off = pl.multiple_of(t * Bp, 8)
        gx = gx_scr[pl.ds(off, Bp), :]                              # (Bp, 4H)
        gates = gx + jnp.dot(h, whh, preferred_element_type=jnp.float32)
        i = jax.nn.sigmoid(gates[:, 0 * H:1 * H])
        f = jax.nn.sigmoid(gates[:, 1 * H:2 * H])
        g = jnp.tanh(gates[:, 2 * H:3 * H])
        o = jax.nn.sigmoid(gates[:, 3 * H:4 * H])
        c = f * c + i * g
        h = o * jnp.tanh(c)
        return h, c

    h0 = jnp.zeros((Bp, H), jnp.float32)
    h, _ = lax.fori_loop(0, T, step, (h0, h0), unroll=True)
    out_ref[...] = h                                                # (Bp, H)


def lexical_branch_forward(input_ids, embedding, w_ih, w_hh, b_ih, b_hh):
    """input_ids: (B, T) int32.  Returns (B, H) float32 (== hn.squeeze(0))."""
    B, T = input_ids.shape
    V, E = embedding.shape
    H4 = w_ih.shape[0]
    H = H4 // 4

    SUBLANE = 8
    Bp = max(SUBLANE, ((B + SUBLANE - 1) // SUBLANE) * SUBLANE)

    # Glue: layout plumbing only. Pad batch to a sublane multiple, flatten
    # time-major, transpose weights so features sit on the lane axis, fuse the
    # two biases. (Padded rows use token id 0; they are sliced off below.)
    ids = jnp.zeros((Bp, T), jnp.int32).at[:B].set(input_ids.astype(jnp.int32))
    ids_tm = ids.T.reshape(T * Bp, 1)                     # (T*Bp, 1)
    wih_t = w_ih.T.astype(jnp.float32)                    # (E, 4H)
    whh_t = w_hh.T.astype(jnp.float32)                    # (H, 4H)
    bias = (b_ih + b_hh).reshape(1, H4).astype(jnp.float32)

    vmem = pl.BlockSpec(memory_space=pltpu.MemorySpace.VMEM)
    out = pl.pallas_call(
        lexical_branch_kernel,
        out_shape=jax.ShapeDtypeStruct((Bp, H), jnp.float32),
        in_specs=[vmem] * 5,
        out_specs=vmem,
        scratch_shapes=[
            pltpu.VMEM((T * Bp, H4), jnp.float32),        # precomputed gates_x
        ],
        compiler_params=pltpu.CompilerParams(vmem_limit_bytes=32 * 1024 * 1024),
        # TODO(synk): for large B add a batch-tile grid axis marked "parallel"
        # so v7x's two TensorCores each process half the sequences.
    )(ids_tm, embedding.astype(jnp.float32), wih_t, whh_t, bias)
    return out[:B]


def lexical_branch_ref(input_ids, embedding, w_ih, w_hh, b_ih, b_hh):
    """Pure-JAX reference mirroring PyTorch nn.Embedding + nn.LSTM forward."""
    x = embedding[input_ids]                               # (B, T, E)
    B = x.shape[0]
    H = w_hh.shape[1]

    def step(carry, x_t):
        h, c = carry
        gates = x_t @ w_ih.T + h @ w_hh.T + b_ih + b_hh
        i, f, g, o = jnp.split(gates, 4, axis=-1)
        i = jax.nn.sigmoid(i)
        f = jax.nn.sigmoid(f)
        g = jnp.tanh(g)
        o = jax.nn.sigmoid(o)
        c = f * c + i * g
        h = o * jnp.tanh(c)
        return (h, c), None

    h0 = jnp.zeros((B, H), jnp.float32)
    (h, _), _ = jax.lax.scan(step, (h0, h0), jnp.transpose(x, (1, 0, 2)))
    return h


if __name__ == "__main__":
    # Small shapes consistent with the module's forward.
    vocab_size, embed_dim, hidden_dim = 64, 32, 32
    batch, seq = 2, 8

    key = jax.random.PRNGKey(0)
    k_ids, k_emb, k_wih, k_whh, k_bih, k_bhh = jax.random.split(key, 6)

    # Deterministic parameter init (shapes per nn.Embedding / nn.LSTM):
    #   embedding ~ N(0, 1); LSTM params ~ U(-1/sqrt(H), 1/sqrt(H)), gate order i,f,g,o.
    embedding = jax.random.normal(k_emb, (vocab_size, embed_dim), jnp.float32)
    bound = 1.0 / jnp.sqrt(jnp.float32(hidden_dim))
    w_ih = jax.random.uniform(k_wih, (4 * hidden_dim, embed_dim), jnp.float32, -bound, bound)
    w_hh = jax.random.uniform(k_whh, (4 * hidden_dim, hidden_dim), jnp.float32, -bound, bound)
    b_ih = jax.random.uniform(k_bih, (4 * hidden_dim,), jnp.float32, -bound, bound)
    b_hh = jax.random.uniform(k_bhh, (4 * hidden_dim,), jnp.float32, -bound, bound)

    input_ids = jax.random.randint(k_ids, (batch, seq), 0, vocab_size, jnp.int32)

    out = lexical_branch_forward(input_ids, embedding, w_ih, w_hh, b_ih, b_hh)
    out = jax.block_until_ready(out)

    ref = lexical_branch_ref(input_ids, embedding, w_ih, w_hh, b_ih, b_hh)
    assert out.shape == (batch, hidden_dim)
    assert jnp.allclose(out, ref, atol=1e-3, rtol=1e-3), "mismatch vs pure-JAX reference"

    print("KERNEL_OK")
</pallas_src>

<mosaic_0001>
module attributes {stable_mosaic.version = 11 : i64} {
  func.func @lexical_branch_kernel(%arg0: memref<64x1xi32, #tpu.memory_space<vmem>>, %arg1: memref<64x32xf32, #tpu.memory_space<vmem>>, %arg2: memref<32x128xf32, #tpu.memory_space<vmem>>, %arg3: memref<32x128xf32, #tpu.memory_space<vmem>>, %arg4: memref<1x128xf32, #tpu.memory_space<vmem>>, %arg5: memref<8x32xf32, #tpu.memory_space<vmem>>, %arg6: memref<64x128xf32, #tpu.memory_space<vmem>>) attributes {dimension_semantics = [], scalar_prefetch = 0 : i64, scratch_operands = 1 : i64, tpu.core_type = #tpu.core_type<tc>} {
    %c0 = arith.constant 0 : index
    %c0_0 = arith.constant 0 : index
    %0 = vector.load %arg1[%c0, %c0_0] : memref<64x32xf32, #tpu.memory_space<vmem>>, vector<64x32xf32>
    %c0_1 = arith.constant 0 : index
    %c0_2 = arith.constant 0 : index
    %1 = vector.load %arg2[%c0_1, %c0_2] : memref<32x128xf32, #tpu.memory_space<vmem>>, vector<32x128xf32>
    %cst = arith.constant dense<0.000000e+00> : vector<64x128xf32>
    %2 = tpu.matmul %0, %1, %cst {dimension_numbers = #tpu.dot_dimension_numbers<[1], [0], [0], [1], [0, 0, 1, 1], [], []>} : vector<64x32xf32>, vector<32x128xf32>, vector<64x128xf32> -> vector<64x128xf32>
    %c0_3 = arith.constant 0 : index
    %c0_4 = arith.constant 0 : index
    %3 = vector.load %arg0[%c0_3, %c0_4] : memref<64x1xi32, #tpu.memory_space<vmem>>, vector<64x1xi32>
    %4 = tpu.iota {dimensions = array<i32: 1>} : vector<64x64xi32>
    %5 = vector.broadcast %3 : vector<64x1xi32> to vector<64x64xi32>
    %6 = arith.cmpi eq, %4, %5 : vector<64x64xi32>
    %7 = arith.extui %6 : vector<64x64xi1> to vector<64x64xi32>
    %8 = arith.sitofp %7 : vector<64x64xi32> to vector<64x64xf32>
    %cst_5 = arith.constant dense<0.000000e+00> : vector<64x128xf32>
    %9 = tpu.matmul %8, %2, %cst_5 {dimension_numbers = #tpu.dot_dimension_numbers<[1], [0], [0], [1], [0, 0, 1, 1], [], []>} : vector<64x64xf32>, vector<64x128xf32>, vector<64x128xf32> -> vector<64x128xf32>
    %c0_6 = arith.constant 0 : index
    %c0_7 = arith.constant 0 : index
    %10 = vector.load %arg4[%c0_6, %c0_7] : memref<1x128xf32, #tpu.memory_space<vmem>>, vector<1x128xf32>
    %11 = vector.broadcast %10 : vector<1x128xf32> to vector<64x128xf32>
    %12 = arith.addf %9, %11 : vector<64x128xf32>
    %c0_8 = arith.constant 0 : index
    %c0_9 = arith.constant 0 : index
    %13 = vector.load %arg6[%c0_8, %c0_9] : memref<64x128xf32, #tpu.memory_space<vmem>>, vector<64x128xf32>
    tpu.vector_store %arg6[%c0_8, %c0_9], %12 {strides = array<i32>} : memref<64x128xf32, #tpu.memory_space<vmem>>, vector<64x128xf32>,
    %c0_10 = arith.constant 0 : index
    %c0_11 = arith.constant 0 : index
    %14 = vector.load %arg3[%c0_10, %c0_11] : memref<32x128xf32, #tpu.memory_space<vmem>>, vector<32x128xf32>
    %cst_12 = arith.constant 0.000000e+00 : f32
    %15 = vector.broadcast %cst_12 : f32 to vector<8x32xf32>
    %c0_i32 = arith.constant 0 : i32
    %c8_i32 = arith.constant 8 : i32
    %16 = arith.muli %c0_i32, %c8_i32 : i32
    %17 = tpu.assume_multiple %16, 8 : i32
    %18 = arith.index_cast %17 : i32 to index
    %c0_13 = arith.constant 0 : index
    %19 = vector.load %arg6[%18, %c0_13] : memref<64x128xf32, #tpu.memory_space<vmem>>, vector<8x128xf32>
    %cst_14 = arith.constant dense<0.000000e+00> : vector<8x128xf32>
    %20 = tpu.matmul %15, %14, %cst_14 {dimension_numbers = #tpu.dot_dimension_numbers<[1], [0], [0], [1], [0, 0, 1, 1], [], []>} : vector<8x32xf32>, vector<32x128xf32>, vector<8x128xf32> -> vector<8x128xf32>
    %21 = arith.addf %19, %20 : vector<8x128xf32>
    %22 = vector.extract_strided_slice %21 {offsets = [0, 0], sizes = [8, 32], strides = [1, 1]} : vector<8x128xf32> to vector<8x32xf32>
    %23 = arith.negf %22 : vector<8x32xf32>
    %24 = math.exp %23 : vector<8x32xf32>
    %cst_15 = arith.constant 1.000000e+00 : f32
    %25 = vector.broadcast %cst_15 : f32 to vector<8x32xf32>
    %26 = arith.addf %25, %24 : vector<8x32xf32>
    %27 = arith.divf %25, %26 : vector<8x32xf32>
    %28 = vector.extract_strided_slice %21 {offsets = [0, 32], sizes = [8, 32], strides = [1, 1]} : vector<8x128xf32> to vector<8x32xf32>
    %29 = arith.negf %28 : vector<8x32xf32>
    %30 = math.exp %29 : vector<8x32xf32>
    %cst_16 = arith.constant 1.000000e+00 : f32
    %31 = vector.broadcast %cst_16 : f32 to vector<8x32xf32>
    %32 = arith.addf %31, %30 : vector<8x32xf32>
    %33 = arith.divf %31, %32 : vector<8x32xf32>
    %34 = vector.extract_strided_slice %21 {offsets = [0, 64], sizes = [8, 32], strides = [1, 1]} : vector<8x128xf32> to vector<8x32xf32>
    %35 = math.tanh %34 : vector<8x32xf32>
    %36 = vector.extract_strided_slice %21 {offsets = [0, 96], sizes = [8, 32], strides = [1, 1]} : vector<8x128xf32> to vector<8x32xf32>
    %37 = arith.negf %36 : vector<8x32xf32>
    %38 = math.exp %37 : vector<8x32xf32>
    %cst_17 = arith.constant 1.000000e+00 : f32
    %39 = vector.broadcast %cst_17 : f32 to vector<8x32xf32>
    %40 = arith.addf %39, %38 : vector<8x32xf32>
    %41 = arith.divf %39, %40 : vector<8x32xf32>
    %42 = arith.mulf %33, %15 : vector<8x32xf32>
    %43 = arith.mulf %27, %35 : vector<8x32xf32>
    %44 = arith.addf %42, %43 : vector<8x32xf32>
    %45 = math.tanh %44 : vector<8x32xf32>
    %46 = arith.mulf %41, %45 : vector<8x32xf32>
    %c1_i32 = arith.constant 1 : i32
    %c8_i32_18 = arith.constant 8 : i32
    %47 = arith.muli %c1_i32, %c8_i32_18 : i32
    %48 = tpu.assume_multiple %47, 8 : i32
    %49 = arith.index_cast %48 : i32 to index
    %c0_19 = arith.constant 0 : index
    %50 = vector.load %arg6[%49, %c0_19] : memref<64x128xf32, #tpu.memory_space<vmem>>, vector<8x128xf32>
    %cst_20 = arith.constant dense<0.000000e+00> : vector<8x128xf32>
    %51 = tpu.matmul %46, %14, %cst_20 {dimension_numbers = #tpu.dot_dimension_numbers<[1], [0], [0], [1], [0, 0, 1, 1], [], []>} : vector<8x32xf32>, vector<32x128xf32>, vector<8x128xf32> -> vector<8x128xf32>
    %52 = arith.addf %50, %51 : vector<8x128xf32>
    %53 = vector.extract_strided_slice %52 {offsets = [0, 0], sizes = [8, 32], strides = [1, 1]} : vector<8x128xf32> to vector<8x32xf32>
    %54 = arith.negf %53 : vector<8x32xf32>
    %55 = math.exp %54 : vector<8x32xf32>
    %cst_21 = arith.constant 1.000000e+00 : f32
    %56 = vector.broadcast %cst_21 : f32 to vector<8x32xf32>
    %57 = arith.addf %56, %55 : vector<8x32xf32>
    %58 = arith.divf %56, %57 : vector<8x32xf32>
    %59 = vector.extract_strided_slice %52 {offsets = [0, 32], sizes = [8, 32], strides = [1, 1]} : vector<8x128xf32> to vector<8x32xf32>
    %60 = arith.negf %59 : vector<8x32xf32>
    %61 = math.exp %60 : vector<8x32xf32>
    %cst_22 = arith.constant 1.000000e+00 : f32
    %62 = vector.broadcast %cst_22 : f32 to vector<8x32xf32>
    %63 = arith.addf %62, %61 : vector<8x32xf32>
    %64 = arith.divf %62, %63 : vector<8x32xf32>
    %65 = vector.extract_strided_slice %52 {offsets = [0, 64], sizes = [8, 32], strides = [1, 1]} : vector<8x128xf32> to vector<8x32xf32>
    %66 = math.tanh %65 : vector<8x32xf32>
    %67 = vector.extract_strided_slice %52 {offsets = [0, 96], sizes = [8, 32], strides = [1, 1]} : vector<8x128xf32> to vector<8x32xf32>
    %68 = arith.negf %67 : vector<8x32xf32>
    %69 = math.exp %68 : vector<8x32xf32>
    %cst_23 = arith.constant 1.000000e+00 : f32
    %70 = vector.broadcast %cst_23 : f32 to vector<8x32xf32>
    %71 = arith.addf %70, %69 : vector<8x32xf32>
    %72 = arith.divf %70, %71 : vector<8x32xf32>
    %73 = arith.mulf %64, %44 : vector<8x32xf32>
    %74 = arith.mulf %58, %66 : vector<8x32xf32>
    %75 = arith.addf %73, %74 : vector<8x32xf32>
    %76 = math.tanh %75 : vector<8x32xf32>
    %77 = arith.mulf %72, %76 : vector<8x32xf32>
    %c2_i32 = arith.constant 2 : i32
    %c8_i32_24 = arith.constant 8 : i32
    %78 = arith.muli %c2_i32, %c8_i32_24 : i32
    %79 = tpu.assume_multiple %78, 8 : i32
    %80 = arith.index_cast %79 : i32 to index
    %c0_25 = arith.constant 0 : index
    %81 = vector.load %arg6[%80, %c0_25] : memref<64x128xf32, #tpu.memory_space<vmem>>, vector<8x128xf32>
    %cst_26 = arith.constant dense<0.000000e+00> : vector<8x128xf32>
    %82 = tpu.matmul %77, %14, %cst_26 {dimension_numbers = #tpu.dot_dimension_numbers<[1], [0], [0], [1], [0, 0, 1, 1], [], []>} : vector<8x32xf32>, vector<32x128xf32>, vector<8x128xf32> -> vector<8x128xf32>
    %83 = arith.addf %81, %82 : vector<8x128xf32>
    %84 = vector.extract_strided_slice %83 {offsets = [0, 0], sizes = [8, 32], strides = [1, 1]} : vector<8x128xf32> to vector<8x32xf32>
    %85 = arith.negf %84 : vector<8x32xf32>
    %86 = math.exp %85 : vector<8x32xf32>
    %cst_27 = arith.constant 1.000000e+00 : f32
    %87 = vector.broadcast %cst_27 : f32 to vector<8x32xf32>
    %88 = arith.addf %87, %86 : vector<8x32xf32>
    %89 = arith.divf %87, %88 : vector<8x32xf32>
    %90 = vector.extract_strided_slice %83 {offsets = [0, 32], sizes = [8, 32], strides = [1, 1]} : vector<8x128xf32> to vector<8x32xf32>
    %91 = arith.negf %90 : vector<8x32xf32>
    %92 = math.exp %91 : vector<8x32xf32>
    %cst_28 = arith.constant 1.000000e+00 : f32
    %93 = vector.broadcast %cst_28 : f32 to vector<8x32xf32>
    %94 = arith.addf %93, %92 : vector<8x32xf32>
    %95 = arith.divf %93, %94 : vector<8x32xf32>
    %96 = vector.extract_strided_slice %83 {offsets = [0, 64], sizes = [8, 32], strides = [1, 1]} : vector<8x128xf32> to vector<8x32xf32>
    %97 = math.tanh %96 : vector<8x32xf32>
    %98 = vector.extract_strided_slice %83 {offsets = [0, 96], sizes = [8, 32], strides = [1, 1]} : vector<8x128xf32> to vector<8x32xf32>
    %99 = arith.negf %98 : vector<8x32xf32>
    %100 = math.exp %99 : vector<8x32xf32>
    %cst_29 = arith.constant 1.000000e+00 : f32
    %101 = vector.broadcast %cst_29 : f32 to vector<8x32xf32>
    %102 = arith.addf %101, %100 : vector<8x32xf32>
    %103 = arith.divf %101, %102 : vector<8x32xf32>
    %104 = arith.mulf %95, %75 : vector<8x32xf32>
    %105 = arith.mulf %89, %97 : vector<8x32xf32>
    %106 = arith.addf %104, %105 : vector<8x32xf32>
    %107 = math.tanh %106 : vector<8x32xf32>
    %108 = arith.mulf %103, %107 : vector<8x32xf32>
    %c3_i32 = arith.constant 3 : i32
    %c8_i32_30 = arith.constant 8 : i32
    %109 = arith.muli %c3_i32, %c8_i32_30 : i32
    %110 = tpu.assume_multiple %109, 8 : i32
    %111 = arith.index_cast %110 : i32 to index
    %c0_31 = arith.constant 0 : index
    %112 = vector.load %arg6[%111, %c0_31] : memref<64x128xf32, #tpu.memory_space<vmem>>, vector<8x128xf32>
    %cst_32 = arith.constant dense<0.000000e+00> : vector<8x128xf32>
    %113 = tpu.matmul %108, %14, %cst_32 {dimension_numbers = #tpu.dot_dimension_numbers<[1], [0], [0], [1], [0, 0, 1, 1], [], []>} : vector<8x32xf32>, vector<32x128xf32>, vector<8x128xf32> -> vector<8x128xf32>
    %114 = arith.addf %112, %113 : vector<8x128xf32>
    %115 = vector.extract_strided_slice %114 {offsets = [0, 0], sizes = [8, 32], strides = [1, 1]} : vector<8x128xf32> to vector<8x32xf32>
    %116 = arith.negf %115 : vector<8x32xf32>
    %117 = math.exp %116 : vector<8x32xf32>
    %cst_33 = arith.constant 1.000000e+00 : f32
    %118 = vector.broadcast %cst_33 : f32 to vector<8x32xf32>
    %119 = arith.addf %118, %117 : vector<8x32xf32>
    %120 = arith.divf %118, %119 : vector<8x32xf32>
    %121 = vector.extract_strided_slice %114 {offsets = [0, 32], sizes = [8, 32], strides = [1, 1]} : vector<8x128xf32> to vector<8x32xf32>
    %122 = arith.negf %121 : vector<8x32xf32>
    %123 = math.exp %122 : vector<8x32xf32>
    %cst_34 = arith.constant 1.000000e+00 : f32
    %124 = vector.broadcast %cst_34 : f32 to vector<8x32xf32>
    %125 = arith.addf %124, %123 : vector<8x32xf32>
    %126 = arith.divf %124, %125 : vector<8x32xf32>
    %127 = vector.extract_strided_slice %114 {offsets = [0, 64], sizes = [8, 32], strides = [1, 1]} : vector<8x128xf32> to vector<8x32xf32>
    %128 = math.tanh %127 : vector<8x32xf32>
    %129 = vector.extract_strided_slice %114 {offsets = [0, 96], sizes = [8, 32], strides = [1, 1]} : vector<8x128xf32> to vector<8x32xf32>
    %130 = arith.negf %129 : vector<8x32xf32>
    %131 = math.exp %130 : vector<8x32xf32>
    %cst_35 = arith.constant 1.000000e+00 : f32
    %132 = vector.broadcast %cst_35 : f32 to vector<8x32xf32>
    %133 = arith.addf %132, %131 : vector<8x32xf32>
    %134 = arith.divf %132, %133 : vector<8x32xf32>
    %135 = arith.mulf %126, %106 : vector<8x32xf32>
    %136 = arith.mulf %120, %128 : vector<8x32xf32>
    %137 = arith.addf %135, %136 : vector<8x32xf32>
    %138 = math.tanh %137 : vector<8x32xf32>
    %139 = arith.mulf %134, %138 : vector<8x32xf32>
    %c4_i32 = arith.constant 4 : i32
    %c8_i32_36 = arith.constant 8 : i32
    %140 = arith.muli %c4_i32, %c8_i32_36 : i32
    %141 = tpu.assume_multiple %140, 8 : i32
    %142 = arith.index_cast %141 : i32 to index
    %c0_37 = arith.constant 0 : index
    %143 = vector.load %arg6[%142, %c0_37] : memref<64x128xf32, #tpu.memory_space<vmem>>, vector<8x128xf32>
    %cst_38 = arith.constant dense<0.000000e+00> : vector<8x128xf32>
    %144 = tpu.matmul %139, %14, %cst_38 {dimension_numbers = #tpu.dot_dimension_numbers<[1], [0], [0], [1], [0, 0, 1, 1], [], []>} : vector<8x32xf32>, vector<32x128xf32>, vector<8x128xf32> -> vector<8x128xf32>
    %145 = arith.addf %143, %144 : vector<8x128xf32>
    %146 = vector.extract_strided_slice %145 {offsets = [0, 0], sizes = [8, 32], strides = [1, 1]} : vector<8x128xf32> to vector<8x32xf32>
    %147 = arith.negf %146 : vector<8x32xf32>
    %148 = math.exp %147 : vector<8x32xf32>
    %cst_39 = arith.constant 1.000000e+00 : f32
    %149 = vector.broadcast %cst_39 : f32 to vector<8x32xf32>
    %150 = arith.addf %149, %148 : vector<8x32xf32>
    %151 = arith.divf %149, %150 : vector<8x32xf32>
    %152 = vector.extract_strided_slice %145 {offsets = [0, 32], sizes = [8, 32], strides = [1, 1]} : vector<8x128xf32> to vector<8x32xf32>
    %153 = arith.negf %152 : vector<8x32xf32>
    %154 = math.exp %153 : vector<8x32xf32>
    %cst_40 = arith.constant 1.000000e+00 : f32
    %155 = vector.broadcast %cst_40 : f32 to vector<8x32xf32>
    %156 = arith.addf %155, %154 : vector<8x32xf32>
    %157 = arith.divf %155, %156 : vector<8x32xf32>
    %158 = vector.extract_strided_slice %145 {offsets = [0, 64], sizes = [8, 32], strides = [1, 1]} : vector<8x128xf32> to vector<8x32xf32>
    %159 = math.tanh %158 : vector<8x32xf32>
    %160 = vector.extract_strided_slice %145 {offsets = [0, 96], sizes = [8, 32], strides = [1, 1]} : vector<8x128xf32> to vector<8x32xf32>
    %161 = arith.negf %160 : vector<8x32xf32>
    %162 = math.exp %161 : vector<8x32xf32>
    %cst_41 = arith.constant 1.000000e+00 : f32
    %163 = vector.broadcast %cst_41 : f32 to vector<8x32xf32>
    %164 = arith.addf %163, %162 : vector<8x32xf32>
    %165 = arith.divf %163, %164 : vector<8x32xf32>
    %166 = arith.mulf %157, %137 : vector<8x32xf32>
    %167 = arith.mulf %151, %159 : vector<8x32xf32>
    %168 = arith.addf %166, %167 : vector<8x32xf32>
    %169 = math.tanh %168 : vector<8x32xf32>
    %170 = arith.mulf %165, %169 : vector<8x32xf32>
    %c5_i32 = arith.constant 5 : i32
    %c8_i32_42 = arith.constant 8 : i32
    %171 = arith.muli %c5_i32, %c8_i32_42 : i32
    %172 = tpu.assume_multiple %171, 8 : i32
    %173 = arith.index_cast %172 : i32 to index
    %c0_43 = arith.constant 0 : index
    %174 = vector.load %arg6[%173, %c0_43] : memref<64x128xf32, #tpu.memory_space<vmem>>, vector<8x128xf32>
    %cst_44 = arith.constant dense<0.000000e+00> : vector<8x128xf32>
    %175 = tpu.matmul %170, %14, %cst_44 {dimension_numbers = #tpu.dot_dimension_numbers<[1], [0], [0], [1], [0, 0, 1, 1], [], []>} : vector<8x32xf32>, vector<32x128xf32>, vector<8x128xf32> -> vector<8x128xf32>
    %176 = arith.addf %174, %175 : vector<8x128xf32>
    %177 = vector.extract_strided_slice %176 {offsets = [0, 0], sizes = [8, 32], strides = [1, 1]} : vector<8x128xf32> to vector<8x32xf32>
    %178 = arith.negf %177 : vector<8x32xf32>
    %179 = math.exp %178 : vector<8x32xf32>
    %cst_45 = arith.constant 1.000000e+00 : f32
    %180 = vector.broadcast %cst_45 : f32 to vector<8x32xf32>
    %181 = arith.addf %180, %179 : vector<8x32xf32>
    %182 = arith.divf %180, %181 : vector<8x32xf32>
    %183 = vector.extract_strided_slice %176 {offsets = [0, 32], sizes = [8, 32], strides = [1, 1]} : vector<8x128xf32> to vector<8x32xf32>
    %184 = arith.negf %183 : vector<8x32xf32>
    %185 = math.exp %184 : vector<8x32xf32>
    %cst_46 = arith.constant 1.000000e+00 : f32
    %186 = vector.broadcast %cst_46 : f32 to vector<8x32xf32>
    %187 = arith.addf %186, %185 : vector<8x32xf32>
    %188 = arith.divf %186, %187 : vector<8x32xf32>
    %189 = vector.extract_strided_slice %176 {offsets = [0, 64], sizes = [8, 32], strides = [1, 1]} : vector<8x128xf32> to vector<8x32xf32>
    %190 = math.tanh %189 : vector<8x32xf32>
    %191 = vector.extract_strided_slice %176 {offsets = [0, 96], sizes = [8, 32], strides = [1, 1]} : vector<8x128xf32> to vector<8x32xf32>
    %192 = arith.negf %191 : vector<8x32xf32>
    %193 = math.exp %192 : vector<8x32xf32>
    %cst_47 = arith.constant 1.000000e+00 : f32
    %194 = vector.broadcast %cst_47 : f32 to vector<8x32xf32>
    %195 = arith.addf %194, %193 : vector<8x32xf32>
    %196 = arith.divf %194, %195 : vector<8x32xf32>
    %197 = arith.mulf %188, %168 : vector<8x32xf32>
    %198 = arith.mulf %182, %190 : vector<8x32xf32>
    %199 = arith.addf %197, %198 : vector<8x32xf32>
    %200 = math.tanh %199 : vector<8x32xf32>
    %201 = arith.mulf %196, %200 : vector<8x32xf32>
    %c6_i32 = arith.constant 6 : i32
    %c8_i32_48 = arith.constant 8 : i32
    %202 = arith.muli %c6_i32, %c8_i32_48 : i32
    %203 = tpu.assume_multiple %202, 8 : i32
    %204 = arith.index_cast %203 : i32 to index
    %c0_49 = arith.constant 0 : index
    %205 = vector.load %arg6[%204, %c0_49] : memref<64x128xf32, #tpu.memory_space<vmem>>, vector<8x128xf32>
    %cst_50 = arith.constant dense<0.000000e+00> : vector<8x128xf32>
    %206 = tpu.matmul %201, %14, %cst_50 {dimension_numbers = #tpu.dot_dimension_numbers<[1], [0], [0], [1], [0, 0, 1, 1], [], []>} : vector<8x32xf32>, vector<32x128xf32>, vector<8x128xf32> -> vector<8x128xf32>
    %207 = arith.addf %205, %206 : vector<8x128xf32>
    %208 = vector.extract_strided_slice %207 {offsets = [0, 0], sizes = [8, 32], strides = [1, 1]} : vector<8x128xf32> to vector<8x32xf32>
    %209 = arith.negf %208 : vector<8x32xf32>
    %210 = math.exp %209 : vector<8x32xf32>
    %cst_51 = arith.constant 1.000000e+00 : f32
    %211 = vector.broadcast %cst_51 : f32 to vector<8x32xf32>
    %212 = arith.addf %211, %210 : vector<8x32xf32>
    %213 = arith.divf %211, %212 : vector<8x32xf32>
    %214 = vector.extract_strided_slice %207 {offsets = [0, 32], sizes = [8, 32], strides = [1, 1]} : vector<8x128xf32> to vector<8x32xf32>
    %215 = arith.negf %214 : vector<8x32xf32>
    %216 = math.exp %215 : vector<8x32xf32>
    %cst_52 = arith.constant 1.000000e+00 : f32
    %217 = vector.broadcast %cst_52 : f32 to vector<8x32xf32>
    %218 = arith.addf %217, %216 : vector<8x32xf32>
    %219 = arith.divf %217, %218 : vector<8x32xf32>
    %220 = vector.extract_strided_slice %207 {offsets = [0, 64], sizes = [8, 32], strides = [1, 1]} : vector<8x128xf32> to vector<8x32xf32>
    %221 = math.tanh %220 : vector<8x32xf32>
    %222 = vector.extract_strided_slice %207 {offsets = [0, 96], sizes = [8, 32], strides = [1, 1]} : vector<8x128xf32> to vector<8x32xf32>
    %223 = arith.negf %222 : vector<8x32xf32>
    %224 = math.exp %223 : vector<8x32xf32>
    %cst_53 = arith.constant 1.000000e+00 : f32
    %225 = vector.broadcast %cst_53 : f32 to vector<8x32xf32>
    %226 = arith.addf %225, %224 : vector<8x32xf32>
    %227 = arith.divf %225, %226 : vector<8x32xf32>
    %228 = arith.mulf %219, %199 : vector<8x32xf32>
    %229 = arith.mulf %213, %221 : vector<8x32xf32>
    %230 = arith.addf %228, %229 : vector<8x32xf32>
    %231 = math.tanh %230 : vector<8x32xf32>
    %232 = arith.mulf %227, %231 : vector<8x32xf32>
    %c7_i32 = arith.constant 7 : i32
    %c8_i32_54 = arith.constant 8 : i32
    %233 = arith.muli %c7_i32, %c8_i32_54 : i32
    %234 = tpu.assume_multiple %233, 8 : i32
    %235 = arith.index_cast %234 : i32 to index
    %c0_55 = arith.constant 0 : index
    %236 = vector.load %arg6[%235, %c0_55] : memref<64x128xf32, #tpu.memory_space<vmem>>, vector<8x128xf32>
    %cst_56 = arith.constant dense<0.000000e+00> : vector<8x128xf32>
    %237 = tpu.matmul %232, %14, %cst_56 {dimension_numbers = #tpu.dot_dimension_numbers<[1], [0], [0], [1], [0, 0, 1, 1], [], []>} : vector<8x32xf32>, vector<32x128xf32>, vector<8x128xf32> -> vector<8x128xf32>
    %238 = arith.addf %236, %237 : vector<8x128xf32>
    %239 = vector.extract_strided_slice %238 {offsets = [0, 0], sizes = [8, 32], strides = [1, 1]} : vector<8x128xf32> to vector<8x32xf32>
    %240 = arith.negf %239 : vector<8x32xf32>
    %241 = math.exp %240 : vector<8x32xf32>
    %cst_57 = arith.constant 1.000000e+00 : f32
    %242 = vector.broadcast %cst_57 : f32 to vector<8x32xf32>
    %243 = arith.addf %242, %241 : vector<8x32xf32>
    %244 = arith.divf %242, %243 : vector<8x32xf32>
    %245 = vector.extract_strided_slice %238 {offsets = [0, 32], sizes = [8, 32], strides = [1, 1]} : vector<8x128xf32> to vector<8x32xf32>
    %246 = arith.negf %245 : vector<8x32xf32>
    %247 = math.exp %246 : vector<8x32xf32>
    %cst_58 = arith.constant 1.000000e+00 : f32
    %248 = vector.broadcast %cst_58 : f32 to vector<8x32xf32>
    %249 = arith.addf %248, %247 : vector<8x32xf32>
    %250 = arith.divf %248, %249 : vector<8x32xf32>
    %251 = vector.extract_strided_slice %238 {offsets = [0, 64], sizes = [8, 32], strides = [1, 1]} : vector<8x128xf32> to vector<8x32xf32>
    %252 = math.tanh %251 : vector<8x32xf32>
    %253 = vector.extract_strided_slice %238 {offsets = [0, 96], sizes = [8, 32], strides = [1, 1]} : vector<8x128xf32> to vector<8x32xf32>
    %254 = arith.negf %253 : vector<8x32xf32>
    %255 = math.exp %254 : vector<8x32xf32>
    %cst_59 = arith.constant 1.000000e+00 : f32
    %256 = vector.broadcast %cst_59 : f32 to vector<8x32xf32>
    %257 = arith.addf %256, %255 : vector<8x32xf32>
    %258 = arith.divf %256, %257 : vector<8x32xf32>
    %259 = arith.mulf %250, %230 : vector<8x32xf32>
    %260 = arith.mulf %244, %252 : vector<8x32xf32>
    %261 = arith.addf %259, %260 : vector<8x32xf32>
    %262 = math.tanh %261 : vector<8x32xf32>
    %263 = arith.mulf %258, %262 : vector<8x32xf32>
    %c8_i32_60 = arith.constant 8 : i32
    %c0_61 = arith.constant 0 : index
    %c0_62 = arith.constant 0 : index
    %264 = vector.load %arg5[%c0_61, %c0_62] : memref<8x32xf32, #tpu.memory_space<vmem>>, vector<8x32xf32>
    tpu.vector_store %arg5[%c0_61, %c0_62], %263 {strides = array<i32>} : memref<8x32xf32, #tpu.memory_space<vmem>>, vector<8x32xf32>,
    return
  }
}

</mosaic_0001>

<bundles_post_ra>
// kernel: tpu_custom_call.1
= control target key start
LH: loop header
LB: loop body
LE: loop exit
PB: predicated region body
PF: predicated region fallthrough
CT: control target
= control target key end

     0   :  { %s1171_s0 = inlined_call_operand.vmem [shape: s32[64,1], index: 0, kind: input, shape index: {}]   ;;  %s1172_s1 = inlined_call_operand.vmem [shape: f32[64,32], index: 1, kind: input, shape index: {}]   ;;  %s1173_s2 = inlined_call_operand.vmem [shape: f32[32,128], index: 2, kind: input, shape index: {}]   ;;  %s1174_s3 = inlined_call_operand.vmem [shape: f32[32,128], index: 3, kind: input, shape index: {}]   ;;  %s1175_s4 = inlined_call_operand.vmem [shape: f32[1,128], index: 4, kind: input, shape index: {}]   ;;  %s1176_s5 = inlined_call_operand.hbm [shape: f32[8,32], index: 5, kind: output, shape index: {}]  }
   0x1   :  { %v32_v0 = vld [vmem:[%s1173_s2 + $0x18] sm:$0xff]  ;;  %v31_v1 = vld [vmem:[%s1173_s2 + $0x10] sm:$0xff]  ;;  %v30_v2 = vld [vmem:[%s1173_s2 + $0x8] sm:$0xff] }
   0x2   :  { %70 = vmatpush.msra.mxu0 %v32_v0  ;;  %816 = vmatpush.msra.mxu3 %v32_v0 }
   0x4   :  { %71 = vmatpush.msra.mxu0 %v31_v1  ;;  %817 = vmatpush.msra.mxu3 %v31_v1 }
   0x5   :  { %10 = vsyncpa [#allocation4], 0  ;;  %v29_v3 = vld [vmem:[%s1173_s2] sm:$0xff]  ;;  %vm33_vm0 = vcmask 261120   ;;  %v22_v5 = vld [vmem:[%s1172_s1 + $0x8] sm:$0xff]  ;;  %v927_v10 = vmov 0   ;;  %v107_v28 = vlaneseq }
   0x6   :  { %72 = vmatpush.msra.mxu0 %v30_v2  ;;  %v21_v4 = vld [vmem:[%s1172_s1] sm:$0xff]  ;;  %818 = vmatpush.msra.mxu3 %v30_v2  ;;  %v28_v6 = vld [vmem:[%s1172_s1 + $0x38] sm:$0xff]  ;;  %v23_v7 = vld [vmem:[%s1172_s1 + $0x10] sm:$0xff]  ;;  %v928_v32 = vmov 0.0   ;;  %vm161_vm3 = vcmask 523264   ;;  %s929_s30 = smov 64  }
   0x7   :  { %v105_v8 = vld [vmem:[%s1171_s0 + $0x30] sm:$0xff]  ;;  %v99_v9 = vld [vmem:[%s1171_s0] sm:$0xff]  ;;  %833 = vset.pattern.permute.xlu0 %v927_v10  ;;  %834 = vset.pattern.permute.xlu1 %v927_v10  ;;  %v24_v11 = vld [vmem:[%s1172_s1 + $0x18] sm:$0xff]  ;;  %v1043_v29 = vand.u32 127, %v107_v28  ;;  %s768_s18 = sshll.u32 %s1176_s5, 4  ;;  %s769_s18 = int_to_ptr.hbm [resolvable:$true] %s768_s18 }
   0x8   :  { %73 = vmatpush.msra.mxu0 %v29_v3  ;;  %819 = vmatpush.msra.mxu3 %v29_v3  ;;  %v106_v12 = vld [vmem:[%s1171_s0 + $0x38] sm:$0xff]  ;;  %v25_v13 = vld [vmem:[%s1172_s1 + $0x20] sm:$0xff]  ;;  %v26_v14 = vld [vmem:[%s1172_s1 + $0x28] sm:$0xff] }
   0x9   :  { %777 = vmatmul.msk.f32.vlgmr.msra.gmra.mxu0 %vm33_vm0, %v21_v4  ;;  %784 = vmatmul.msk.f32.vlgmr.msra.gmra.mxu3 %vm33_vm0, %v28_v6  ;;  %v27_v15 = vld [vmem:[%s1172_s1 + $0x30] sm:$0xff]  ;;  %v1018_v21 = vld [vmem:[%s1174_s3 + $0x18] sm:$0xff]  ;;  %v1030_v24 = vld [vmem:[%s1174_s3 + $0x8] sm:$0xff] }
   0xa   :  { %128 = vperm.xlu0 %833, %v105_v8   ;;  %110 = vperm.xlu1 %834, %v99_v9   ;;  %v1024_v23 = vld [vmem:[%s1174_s3 + $0x10] sm:$0xff]  ;;  %v1036_v26 = vld [vmem:[%s1174_s3] sm:$0xff]  ;;  %v100_v45 = vld [vmem:[%s1171_s0 + $0x8] sm:$0xff] }
   0xb   :  { %835 = vset.pattern.permute.xlu2 %v927_v10  ;;  %320 = vmatpush.msrb.mxu3 %v1018_v21  ;;  %v1074_v40 = vld [vmem:[%s1175_s4] ss:$0 sm:$0xff]  ;;  %s930_s4 = smov 32  }
   0xd   :  { %321 = vmatpush.msrb.mxu3 %v1024_v23 }
   0xf   :  { %322 = vmatpush.msrb.mxu3 %v1030_v24 }
  0x11   :  { %778 = vmatmul.msk.f32.gmra.mxu0 %vm33_vm0, %v22_v5  ;;  %323 = vmatpush.msrb.mxu3 %v1036_v26 }
  0x12   :  { %131 = vperm.xlu0 %833, %v106_v12  }
  0x13   :  { %450 = vmatpush.msra.mxu3 %v1018_v21 }
  0x15   :  { %451 = vmatpush.msra.mxu3 %v1024_v23 }
  0x17   :  { %452 = vmatpush.msra.mxu3 %v1030_v24 }
  0x19   :  { %779 = vmatmul.msk.f32.gmra.mxu0 %vm33_vm0, %v23_v7  ;;  %453 = vmatpush.msra.mxu3 %v1036_v26 }
  0x21   :  { %780 = vmatmul.msk.f32.gmra.mxu0 %vm33_vm0, %v24_v11 }
  0x29   :  { %781 = vmatmul.msk.f32.gmra.mxu0 %vm33_vm0, %v25_v13 }
  0x31   :  { %782 = vmatmul.msk.f32.gmra.mxu0 %vm33_vm0, %v26_v14 }
  0x39   :  { %783 = vmatmul.msk.f32.gmra.mxu0 %vm33_vm0, %v27_v15 }
  0x7c   :  { %v129_v30 = vpop.permute.xlu0 %128  ;;  %v111_v31 = vpop.permute.xlu1 %110 }
  0x7d   :  { %vm139_vm1 = vcmp.eq.s32.totalorder %v1043_v29, %v129_v30  ;;  %vm133_vm2 = vcmp.eq.s32.totalorder %v1043_v29, %v111_v31  ;;  %v101_v31 = vld [vmem:[%s1171_s0 + $0x10] sm:$0xff] }
  0x7e   :  { %v791_v33 = vsel %vm139_vm1, 1.0, %v928_v32  ;;  %v785_v34 = vsel %vm133_vm2, 1.0, %v928_v32 }
  0x84   :  { %v132_v35 = vpop.permute.xlu0 %131 }
  0x85   :  { %vm140_vm4 = vcmp.eq.s32.totalorder %v1043_v29, %v132_v35 }
  0x86   :  { %v75_v16 = vpop.f32.mrf.mxu0  ;;  %v792_v36 = vsel %vm140_vm4, 1.0, %v928_v32 }
  0x8c   :  { %v96_v18 = vpop.f32.mrf.mxu3 }
  0x8d   :  { %194 = vmatpush.msra.mxu1 %v96_v18  ;;  %820 = vmatpush.msra.mxu2 %v96_v18 }
  0x8e   :  { %v78_v17 = vpop.f32.mrf.mxu0 }
  0x96   :  { %v81_v19 = vpop.f32.mrf.mxu0 }
  0x9e   :  { %v84_v20 = vpop.f32.mrf.mxu0 }
  0xa6   :  { %v87_v22 = vpop.f32.mrf.mxu0 }
  0xae   :  { %v90_v25 = vpop.f32.mrf.mxu0 }
  0xb6   :  { %v93_v27 = vpop.f32.mrf.mxu0 }
  0xb7   :  { %195 = vmatpush.msra.mxu1 %v93_v27  ;;  %821 = vmatpush.msra.mxu2 %v93_v27 }
  0xb9   :  { %196 = vmatpush.msra.mxu1 %v90_v25  ;;  %822 = vmatpush.msra.mxu2 %v90_v25 }
  0xbb   :  { %197 = vmatpush.msra.mxu1 %v87_v22  ;;  %823 = vmatpush.msra.mxu2 %v87_v22 }
  0xbd   :  { %198 = vmatpush.msra.mxu1 %v84_v20  ;;  %824 = vmatpush.msra.mxu2 %v84_v20 }
  0xbf   :  { %199 = vmatpush.msra.mxu1 %v81_v19  ;;  %825 = vmatpush.msra.mxu2 %v81_v19 }
  0xc1   :  { %200 = vmatpush.msra.mxu1 %v78_v17  ;;  %826 = vmatpush.msra.mxu2 %v78_v17 }
  0xc3   :  { %201 = vmatpush.msra.mxu1 %v75_v16  ;;  %827 = vmatpush.msra.mxu2 %v75_v16 }
  0xc4   :  { %799 = vmatmul.msk.f32.vlgmr.msra.gmra.mxu2 %vm161_vm3, %v791_v33  ;;  %793 = vmatmul.msk.f32.vlgmr.msra.gmra.mxu1 %vm161_vm3, %v785_v34 }
  0xc5   :  { %255 = vmatpush.msrb.mxu2 %v1018_v21 }
  0xc7   :  { %256 = vmatpush.msrb.mxu2 %v1024_v23 }
  0xc9   :  { %257 = vmatpush.msrb.mxu2 %v1030_v24 }
  0xcb   :  { %258 = vmatpush.msrb.mxu2 %v1036_v26 }
  0xcc   :  { %800 = vmatmul.msk.f32.gmra.mxu2 %vm161_vm3, %v792_v36 }
  0xcd   :  { %385 = vmatpush.msra.mxu2 %v1018_v21 }
  0xcf   :  { %386 = vmatpush.msra.mxu2 %v1024_v23 }
  0xd1   :  { %387 = vmatpush.msra.mxu2 %v1030_v24 }
  0xd3   :  { %388 = vmatpush.msra.mxu2 %v1036_v26 }
  0xd4   :  { %259 = vmatmul.f32.vlgmr.msrb.gmra.mxu2 %v928_v32 }
  0xd5   :  { %515 = vmatpush.msrb.mxu2 %v1018_v21 }
  0xd7   :  { %516 = vmatpush.msrb.mxu2 %v1024_v23 }
  0xd9   :  { %517 = vmatpush.msrb.mxu2 %v1030_v24 }
  0xdb   :  { %518 = vmatpush.msrb.mxu2 %v1036_v26 }
 0x141   :  { %v203_v39 = vpop.f32.mrf.mxu1 }
 0x142   :  { %v204_v41 = vadd.f32 %v1074_v40, %v203_v39 }
 0x147   :  { %v1067_v37 = vpop.f32.mrf.mxu2 }
 0x14f   :  { %v1069_v38 = vpop.f32.mrf.mxu2 }
 0x157   :  { %v260_v42 = vpop.f32.mrf.mxu2 }
 0x158   :  { %v263_v43 = vadd.f32 %v260_v42, %v204_v41 }
 0x15a   :  { %837 = vtanh.f32 %v263_v43  ;;  %v801_v46 = vmul.f32 -1.442695, %v263_v43 }
 0x15c   :  { %839 = vpow2.f32 %v801_v46 }
 0x160   :  { %v838_v44 = vpop.eup %837 }
 0x161   :  { %286 = vrot.lane.b32.xlu1 %v838_v44, %s929_s30 }
 0x162   :  { %v840_v47 = vpop.eup %839 }
 0x163   :  { %v267_v48 = vadd.f32 1.0, %v840_v47 }
 0x165   :  { %841 = vrcp.f32 %v267_v48  ;;  %v279_v54 = vand.u32 2147483648, %v267_v48  ;;  %vm273_vm6 = vweird.f32 %v267_v48  ;;  %v277_v55 = vand.u32 2147483647, %v267_v48 }
 0x167   :  { %v280_v57 = vor.u32 1.1754944e-38, %v279_v54  ;;  %vm278_vm8 = vcmp.eq.f32.partialorder %v277_v55, 8.507059e+37 }
 0x169   :  { %113 = vperm.xlu1 %834, %v100_v45  }
 0x16b   :  { %v842_v49 = vpop.eup %841 }
 0x16c   :  { %v269_v50 = vmul.f32 %v842_v49, %v267_v48  ;;  %vm274_vm5 = vweird.f32 %v842_v49 }
 0x16d   :  { %vm275_vm7 = vmor %vm273_vm6, %vm274_vm5 }
 0x16e   :  { %v270_v51 = vsub.f32 1.0, %v269_v50 }
 0x170   :  { %v271_v52 = vmul.f32 %v842_v49, %v270_v51 }
 0x172   :  { %v272_v53 = vadd.f32 %v842_v49, %v271_v52 }
 0x174   :  { %v276_v56 = vsel %vm275_vm7, %v842_v49, %v272_v53 }
 0x175   :  { %v281_v59 = vsel %vm278_vm8, %v280_v57, %v276_v56 }
 0x176   :  { %v284_v63 = vmul.f32 0.0, %v281_v59 }
 0x1d3   :  { %v287_v58 = vpop.permute.xlu1 %286 }
 0x1d4   :  { %v289_v60 = vmul.f32 %v287_v58, %v281_v59 }
 0x1d6   :  { %291 = vrot.lane.b32.xlu2 %v289_v60, %s930_s4 }
 0x1db   :  { %v114_v61 = vpop.permute.xlu1 %113 }
 0x1dc   :  { %vm134_vm9 = vcmp.eq.s32.totalorder %v1043_v29, %v114_v61 }
 0x1dd   :  { %v786_v62 = vsel %vm134_vm9, 1.0, %v928_v32 }
 0x1de   :  { %794 = vmatmul.msk.f32.gmra.mxu1 %vm161_vm3, %v786_v62 }
 0x230   :  { %v292_v0 = vpop.permute.xlu2 %291 }
 0x231   :  { %v294_v1 = vadd.f32 %v292_v0, %v284_v63 }
 0x233   :  { %843 = vtanh.f32 %v294_v1 }
 0x239   :  { %v844_v2 = vpop.eup %843 }
 0x23a   :  { %297 = vrot.lane.b32.xlu2 %v844_v2, %s929_s30 }
 0x25b   :  { %v206_v6 = vpop.f32.mrf.mxu1 }
 0x25c   :  { %v207_v7 = vadd.f32 %v1074_v40, %v206_v6 }
 0x294   :  { %v298_v3 = vpop.permute.xlu2 %297 }
 0x295   :  { %v300_v4 = vmul.f32 %v298_v3, %v281_v59 }
 0x297   :  { %304 = vrot.lane.b32.xlu0 %v300_v4, %s930_s4 }
 0x309   :  { %v305_v5 = vpop.permute.xlu0 %304 }
 0x30a   :  { %802 = vmatmul.msk.f32.vlgmr.msrb.gmra.mxu3 %vm33_vm0, %v305_v5  ;;  %v102_v5 = vld [vmem:[%s1171_s0 + $0x18] sm:$0xff] }
 0x30b   :  { %580 = vmatpush.msrb.mxu3 %v1018_v21 }
 0x30d   :  { %581 = vmatpush.msrb.mxu3 %v1024_v23 }
 0x30f   :  { %582 = vmatpush.msrb.mxu3 %v1030_v24 }
 0x311   :  { %583 = vmatpush.msrb.mxu3 %v1036_v26 }
 0x38d   :  { %v325_v8 = vpop.f32.mrf.mxu3 }
 0x38e   :  { %v328_v9 = vadd.f32 %v325_v8, %v207_v7 }
 0x390   :  { %845 = vtanh.f32 %v328_v9  ;;  %v803_v11 = vmul.f32 -1.442695, %v328_v9 }
 0x392   :  { %847 = vpow2.f32 %v803_v11 }
 0x396   :  { %v846_v10 = vpop.eup %845 }
 0x397   :  { %351 = vrot.lane.b32.xlu2 %v846_v10, %s929_s30 }
 0x398   :  { %v848_v12 = vpop.eup %847 }
 0x399   :  { %v332_v13 = vadd.f32 1.0, %v848_v12 }
 0x39b   :  { %849 = vrcp.f32 %v332_v13  ;;  %v344_v19 = vand.u32 2147483648, %v332_v13  ;;  %vm338_vm11 = vweird.f32 %v332_v13  ;;  %v342_v20 = vand.u32 2147483647, %v332_v13 }
 0x39d   :  { %v345_v25 = vor.u32 1.1754944e-38, %v344_v19  ;;  %vm343_vm13 = vcmp.eq.f32.partialorder %v342_v20, 8.507059e+37 }
 0x3a1   :  { %v850_v14 = vpop.eup %849 }
 0x3a2   :  { %v334_v15 = vmul.f32 %v850_v14, %v332_v13  ;;  %vm339_vm10 = vweird.f32 %v850_v14 }
 0x3a3   :  { %vm340_vm12 = vmor %vm338_vm11, %vm339_vm10 }
 0x3a4   :  { %v335_v16 = vsub.f32 1.0, %v334_v15 }
 0x3a6   :  { %v336_v17 = vmul.f32 %v850_v14, %v335_v16 }
 0x3a8   :  { %v337_v18 = vadd.f32 %v850_v14, %v336_v17 }
 0x3aa   :  { %v341_v22 = vsel %vm340_vm12, %v850_v14, %v337_v18 }
 0x3ab   :  { %v346_v28 = vsel %vm343_vm13, %v345_v25, %v341_v22 }
 0x3ac   :  { %v349_v33 = vmul.f32 %v346_v28, %v294_v1 }
 0x3f1   :  { %v352_v27 = vpop.permute.xlu2 %351 }
 0x3f2   :  { %v354_v30 = vmul.f32 %v352_v27, %v346_v28 }
 0x3f4   :  { %356 = vrot.lane.b32.xlu0 %v354_v30, %s930_s4 }
 0x3fc   :  { %116 = vperm.xlu0 %833, %v101_v31  }
 0x466   :  { %v357_v34 = vpop.permute.xlu0 %356 }
 0x467   :  { %v359_v35 = vadd.f32 %v357_v34, %v349_v33  ;;  %v103_v33 = vld [vmem:[%s1171_s0 + $0x20] sm:$0xff] }
 0x469   :  { %851 = vtanh.f32 %v359_v35 }
 0x46e   :  { %v117_v36 = vpop.permute.xlu0 %116 }
 0x46f   :  { %v852_v39 = vpop.eup %851  ;;  %vm135_vm14 = vcmp.eq.s32.totalorder %v1043_v29, %v117_v36 }
 0x470   :  { %v787_v41 = vsel %vm135_vm14, 1.0, %v928_v32  ;;  %362 = vrot.lane.b32.xlu1 %v852_v39, %s929_s30 }
 0x471   :  { %795 = vmatmul.msk.f32.gmra.mxu1 %vm161_vm3, %v787_v41 }
 0x4e2   :  { %v363_v42 = vpop.permute.xlu1 %362 }
 0x4e3   :  { %v365_v43 = vmul.f32 %v363_v42, %v346_v28 }
 0x4e5   :  { %369 = vrot.lane.b32.xlu2 %v365_v43, %s930_s4 }
 0x4ee   :  { %v209_v45 = vpop.f32.mrf.mxu1 }
 0x4ef   :  { %v210_v46 = vadd.f32 %v1074_v40, %v209_v45 }
 0x53f   :  { %v370_v44 = vpop.permute.xlu2 %369 }
 0x540   :  { %804 = vmatmul.msk.f32.vlgmr.msra.gmra.mxu2 %vm33_vm0, %v370_v44 }
 0x541   :  { %645 = vmatpush.msra.mxu2 %v1018_v21 }
 0x543   :  { %646 = vmatpush.msra.mxu2 %v1024_v23 }
 0x545   :  { %647 = vmatpush.msra.mxu2 %v1030_v24 }
 0x547   :  { %648 = vmatpush.msra.mxu2 %v1036_v26 }
 0x5c3   :  { %v390_v47 = vpop.f32.mrf.mxu2 }
 0x5c4   :  { %v393_v48 = vadd.f32 %v390_v47, %v210_v46 }
 0x5c6   :  { %853 = vtanh.f32 %v393_v48  ;;  %v805_v50 = vmul.f32 -1.442695, %v393_v48 }
 0x5c8   :  { %855 = vpow2.f32 %v805_v50 }
 0x5cc   :  { %v854_v49 = vpop.eup %853 }
 0x5cd   :  { %416 = vrot.lane.b32.xlu1 %v854_v49, %s929_s30 }
 0x5ce   :  { %v856_v51 = vpop.eup %855 }
 0x5cf   :  { %v397_v52 = vadd.f32 1.0, %v856_v51 }
 0x5d1   :  { %857 = vrcp.f32 %v397_v52  ;;  %v409_v58 = vand.u32 2147483648, %v397_v52  ;;  %vm403_vm1 = vweird.f32 %v397_v52  ;;  %v407_v59 = vand.u32 2147483647, %v397_v52 }
 0x5d3   :  { %v410_v61 = vor.u32 1.1754944e-38, %v409_v58  ;;  %vm408_vm4 = vcmp.eq.f32.partialorder %v407_v59, 8.507059e+37 }
 0x5d7   :  { %v858_v53 = vpop.eup %857 }
 0x5d8   :  { %v399_v54 = vmul.f32 %v858_v53, %v397_v52  ;;  %vm404_vm15 = vweird.f32 %v858_v53 }
 0x5d9   :  { %vm405_vm2 = vmor %vm403_vm1, %vm404_vm15 }
 0x5da   :  { %v400_v55 = vsub.f32 1.0, %v399_v54 }
 0x5dc   :  { %v401_v56 = vmul.f32 %v858_v53, %v400_v55 }
 0x5de   :  { %v402_v57 = vadd.f32 %v858_v53, %v401_v56 }
 0x5e0   :  { %v406_v60 = vsel %vm405_vm2, %v858_v53, %v402_v57 }
 0x5e1   :  { %v411_v63 = vsel %vm408_vm4, %v410_v61, %v406_v60 }
 0x5e2   :  { %v414_v1 = vmul.f32 %v411_v63, %v359_v35 }
 0x63f   :  { %v417_v62 = vpop.permute.xlu1 %416 }
 0x640   :  { %v419_v0 = vmul.f32 %v417_v62, %v411_v63 }
 0x642   :  { %421 = vrot.lane.b32.xlu2 %v419_v0, %s930_s4 }
 0x64a   :  { %119 = vperm.xlu2 %835, %v102_v5  }
 0x69c   :  { %v422_v2 = vpop.permute.xlu2 %421 }
 0x69d   :  { %v424_v3 = vadd.f32 %v422_v2, %v414_v1  ;;  %v104_v2 = vld [vmem:[%s1171_s0 + $0x28] sm:$0xff]  ;;  %s931_s0 = smov [#allocation3]  }
 0x69e   :  { %s766_s15 = sshll.u32 %s931_s0, 4  ;;  %s767_s15 = int_to_ptr.vmem [resolvable:$true] %s766_s15 }
 0x69f   :  { %859 = vtanh.f32 %v424_v3 }
 0x6a4   :  { %v120_v8 = vpop.permute.xlu2 %119 }
 0x6a5   :  { %v860_v4 = vpop.eup %859  ;;  %vm136_vm5 = vcmp.eq.s32.totalorder %v1043_v29, %v120_v8 }
 0x6a6   :  { %427 = vrot.lane.b32.xlu0 %v860_v4, %s929_s30  ;;  %v788_v9 = vsel %vm136_vm5, 1.0, %v928_v32 }
 0x6a7   :  { %796 = vmatmul.msk.f32.gmra.mxu1 %vm161_vm3, %v788_v9 }
 0x718   :  { %v428_v6 = vpop.permute.xlu0 %427 }
 0x719   :  { %v430_v7 = vmul.f32 %v428_v6, %v411_v63 }
 0x71b   :  { %434 = vrot.lane.b32.xlu1 %v430_v7, %s930_s4 }
 0x724   :  { %v212_v11 = vpop.f32.mrf.mxu1 }
 0x725   :  { %v213_v12 = vadd.f32 %v1074_v40, %v212_v11 }
 0x78d   :  { %v435_v10 = vpop.permute.xlu1 %434 }
 0x78e   :  { %806 = vmatmul.msk.f32.vlgmr.msra.gmra.mxu3 %vm33_vm0, %v435_v10 }
 0x78f   :  { %710 = vmatpush.msra.mxu3 %v1018_v21 }
 0x791   :  { %711 = vmatpush.msra.mxu3 %v1024_v23 }
 0x793   :  { %712 = vmatpush.msra.mxu3 %v1030_v24 }
 0x795   :  { %713 = vmatpush.msra.mxu3 %v1036_v26 }
 0x811   :  { %v455_v13 = vpop.f32.mrf.mxu3 }
 0x812   :  { %v458_v14 = vadd.f32 %v455_v13, %v213_v12 }
 0x814   :  { %861 = vtanh.f32 %v458_v14  ;;  %v807_v16 = vmul.f32 -1.442695, %v458_v14 }
 0x816   :  { %863 = vpow2.f32 %v807_v16 }
 0x81a   :  { %v862_v15 = vpop.eup %861 }
 0x81b   :  { %481 = vrot.lane.b32.xlu0 %v862_v15, %s929_s30 }
 0x81c   :  { %v864_v17 = vpop.eup %863 }
 0x81d   :  { %v462_v18 = vadd.f32 1.0, %v864_v17 }
 0x81f   :  { %865 = vrcp.f32 %v462_v18  ;;  %v474_v26 = vand.u32 2147483648, %v462_v18  ;;  %vm468_vm7 = vweird.f32 %v462_v18  ;;  %v472_v22 = vand.u32 2147483647, %v462_v18 }
 0x821   :  { %v475_v27 = vor.u32 1.1754944e-38, %v474_v26  ;;  %vm473_vm9 = vcmp.eq.f32.partialorder %v472_v22, 8.507059e+37 }
 0x825   :  { %v866_v21 = vpop.eup %865 }
 0x826   :  { %v464_v23 = vmul.f32 %v866_v21, %v462_v18  ;;  %vm469_vm6 = vweird.f32 %v866_v21 }
 0x827   :  { %vm470_vm8 = vmor %vm468_vm7, %vm469_vm6 }
 0x828   :  { %v465_v19 = vsub.f32 1.0, %v464_v23 }
 0x82a   :  { %v466_v24 = vmul.f32 %v866_v21, %v465_v19 }
 0x82c   :  { %v467_v20 = vadd.f32 %v866_v21, %v466_v24 }
 0x82e   :  { %v471_v25 = vsel %vm470_vm8, %v866_v21, %v467_v20 }
 0x82f   :  { %v476_v30 = vsel %vm473_vm9, %v475_v27, %v471_v25 }
 0x830   :  { %v479_v34 = vmul.f32 %v476_v30, %v424_v3 }
 0x88d   :  { %v482_v28 = vpop.permute.xlu0 %481 }
 0x88e   :  { %v484_v31 = vmul.f32 %v482_v28, %v476_v30 }
 0x890   :  { %486 = vrot.lane.b32.xlu1 %v484_v31, %s930_s4 }
 0x898   :  { %122 = vperm.xlu1 %834, %v103_v33  }
 0x902   :  { %v487_v35 = vpop.permute.xlu1 %486 }
 0x903   :  { %v489_v36 = vadd.f32 %v487_v35, %v479_v34 }
 0x905   :  { %867 = vtanh.f32 %v489_v36 }
 0x90a   :  { %v123_v39 = vpop.permute.xlu1 %122 }
 0x90b   :  { %v868_v41 = vpop.eup %867  ;;  %vm137_vm10 = vcmp.eq.s32.totalorder %v1043_v29, %v123_v39 }
 0x90c   :  { %v789_v42 = vsel %vm137_vm10, 1.0, %v928_v32  ;;  %492 = vrot.lane.b32.xlu2 %v868_v41, %s929_s30 }
 0x90d   :  { %797 = vmatmul.msk.f32.gmra.mxu1 %vm161_vm3, %v789_v42  ;;  %v222_v42 = vadd.f32 %v1074_v40, %v1067_v37 }
 0x966   :  { %v493_v43 = vpop.permute.xlu2 %492 }
 0x967   :  { %v495_v44 = vmul.f32 %v493_v43, %v476_v30 }
 0x969   :  { %499 = vrot.lane.b32.xlu0 %v495_v44, %s930_s4 }
 0x98a   :  { %v215_v46 = vpop.f32.mrf.mxu1 }
 0x98b   :  { %v216_v47 = vadd.f32 %v1074_v40, %v215_v46 }
 0x9db   :  { %v500_v45 = vpop.permute.xlu0 %499 }
 0x9dc   :  { %808 = vmatmul.msk.f32.vlgmr.msrb.gmra.mxu2 %vm33_vm0, %v500_v45 }
 0xa5f   :  { %v520_v48 = vpop.f32.mrf.mxu2 }
 0xa60   :  { %v523_v49 = vadd.f32 %v520_v48, %v216_v47 }
 0xa62   :  { %869 = vtanh.f32 %v523_v49  ;;  %v809_v51 = vmul.f32 -1.442695, %v523_v49 }
 0xa64   :  { %871 = vpow2.f32 %v809_v51 }
 0xa68   :  { %v870_v50 = vpop.eup %869 }
 0xa69   :  { %546 = vrot.lane.b32.xlu2 %v870_v50, %s929_s30 }
 0xa6a   :  { %v872_v52 = vpop.eup %871 }
 0xa6b   :  { %v527_v53 = vadd.f32 1.0, %v872_v52 }
 0xa6d   :  { %873 = vrcp.f32 %v527_v53  ;;  %v539_v59 = vand.u32 2147483648, %v527_v53  ;;  %vm533_vm12 = vweird.f32 %v527_v53  ;;  %v537_v60 = vand.u32 2147483647, %v527_v53 }
 0xa6f   :  { %v540_v62 = vor.u32 1.1754944e-38, %v539_v59  ;;  %vm538_vm14 = vcmp.eq.f32.partialorder %v537_v60, 8.507059e+37 }
 0xa73   :  { %v874_v54 = vpop.eup %873 }
 0xa74   :  { %v529_v55 = vmul.f32 %v874_v54, %v527_v53  ;;  %vm534_vm11 = vweird.f32 %v874_v54 }
 0xa75   :  { %vm535_vm13 = vmor %vm533_vm12, %vm534_vm11 }
 0xa76   :  { %v530_v56 = vsub.f32 1.0, %v529_v55 }
 0xa78   :  { %v531_v57 = vmul.f32 %v874_v54, %v530_v56 }
 0xa7a   :  { %v532_v58 = vadd.f32 %v874_v54, %v531_v57 }
 0xa7c   :  { %v536_v61 = vsel %vm535_vm13, %v874_v54, %v532_v58 }
 0xa7d   :  { %v541_v0 = vsel %vm538_vm14, %v540_v62, %v536_v61 }
 0xa7e   :  { %v544_v3 = vmul.f32 %v541_v0, %v489_v36 }
 0xac3   :  { %v547_v63 = vpop.permute.xlu2 %546 }
 0xac4   :  { %v549_v1 = vmul.f32 %v547_v63, %v541_v0 }
 0xac6   :  { %551 = vrot.lane.b32.xlu0 %v549_v1, %s930_s4 }
 0xace   :  { %125 = vperm.xlu0 %833, %v104_v2  }
 0xb38   :  { %v552_v4 = vpop.permute.xlu0 %551 }
 0xb39   :  { %v554_v5 = vadd.f32 %v552_v4, %v544_v3  ;;  %v225_v3 = vadd.f32 %v1074_v40, %v1069_v38 }
 0xb3b   :  { %875 = vtanh.f32 %v554_v5 }
 0xb40   :  { %v126_v6 = vpop.permute.xlu0 %125 }
 0xb41   :  { %v876_v7 = vpop.eup %875  ;;  %vm138_vm15 = vcmp.eq.s32.totalorder %v1043_v29, %v126_v6 }
 0xb42   :  { %v790_v8 = vsel %vm138_vm15, 1.0, %v928_v32  ;;  %557 = vrot.lane.b32.xlu1 %v876_v7, %s929_s30 }
 0xb43   :  { %798 = vmatmul.msk.f32.gmra.mxu1 %vm161_vm3, %v790_v8 }
 0xbb4   :  { %v558_v9 = vpop.permute.xlu1 %557 }
 0xbb5   :  { %v560_v10 = vmul.f32 %v558_v9, %v541_v0 }
 0xbb7   :  { %564 = vrot.lane.b32.xlu2 %v560_v10, %s930_s4 }
 0xbc0   :  { %v218_v12 = vpop.f32.mrf.mxu1 }
 0xbc1   :  { %v219_v13 = vadd.f32 %v1074_v40, %v218_v12 }
 0xc11   :  { %v565_v11 = vpop.permute.xlu2 %564 }
 0xc12   :  { %810 = vmatmul.msk.f32.vlgmr.msrb.gmra.mxu3 %vm33_vm0, %v565_v11 }
 0xc95   :  { %v585_v14 = vpop.f32.mrf.mxu3 }
 0xc96   :  { %v588_v15 = vadd.f32 %v585_v14, %v219_v13 }
 0xc98   :  { %877 = vtanh.f32 %v588_v15  ;;  %v811_v32 = vmul.f32 -1.442695, %v588_v15 }
 0xc9a   :  { %879 = vpow2.f32 %v811_v32 }
 0xc9e   :  { %v878_v29 = vpop.eup %877 }
 0xc9f   :  { %611 = vrot.lane.b32.xlu1 %v878_v29, %s929_s30 }
 0xca0   :  { %v880_v16 = vpop.eup %879 }
 0xca1   :  { %v592_v17 = vadd.f32 1.0, %v880_v16 }
 0xca3   :  { %881 = vrcp.f32 %v592_v17  ;;  %v604_v20 = vand.u32 2147483648, %v592_v17  ;;  %vm598_vm1 = vweird.f32 %v592_v17  ;;  %v602_v26 = vand.u32 2147483647, %v592_v17 }
 0xca5   :  { %v605_v25 = vor.u32 1.1754944e-38, %v604_v20  ;;  %vm603_vm4 = vcmp.eq.f32.partialorder %v602_v26, 8.507059e+37 }
 0xca9   :  { %v882_v18 = vpop.eup %881 }
 0xcaa   :  { %v594_v21 = vmul.f32 %v882_v18, %v592_v17  ;;  %vm599_vm3 = vweird.f32 %v882_v18 }
 0xcab   :  { %vm600_vm2 = vmor %vm598_vm1, %vm599_vm3 }
 0xcac   :  { %v595_v23 = vsub.f32 1.0, %v594_v21 }
 0xcae   :  { %v596_v19 = vmul.f32 %v882_v18, %v595_v23 }
 0xcb0   :  { %v597_v24 = vadd.f32 %v882_v18, %v596_v19 }
 0xcb2   :  { %v601_v22 = vsel %vm600_vm2, %v882_v18, %v597_v24 }
 0xcb3   :  { %v606_v28 = vsel %vm603_vm4, %v605_v25, %v601_v22 }
 0xcb4   :  { %v609_v31 = vmul.f32 %v606_v28, %v554_v5 }
 0xd11   :  { %v612_v27 = vpop.permute.xlu1 %611 }
 0xd12   :  { %v614_v30 = vmul.f32 %v612_v27, %v606_v28 }
 0xd14   :  { %616 = vrot.lane.b32.xlu2 %v614_v30, %s930_s4 }
 0xd6e   :  { %v617_v33 = vpop.permute.xlu2 %616 }
 0xd6f   :  { %v619_v34 = vadd.f32 %v617_v33, %v609_v31 }
 0xd71   :  { %883 = vtanh.f32 %v619_v34 }
 0xd77   :  { %v884_v35 = vpop.eup %883 }
 0xd78   :  { %622 = vrot.lane.b32.xlu0 %v884_v35, %s929_s30 }
 0xdea   :  { %v623_v36 = vpop.permute.xlu0 %622 }
 0xdeb   :  { %v625_v39 = vmul.f32 %v623_v36, %v606_v28 }
 0xded   :  { %629 = vrot.lane.b32.xlu1 %v625_v39, %s930_s4 }
 0xe5f   :  { %v630_v41 = vpop.permute.xlu1 %629 }
 0xe60   :  { %812 = vmatmul.msk.f32.vlgmr.msra.gmra.mxu2 %vm33_vm0, %v630_v41 }
 0xee3   :  { %v650_v43 = vpop.f32.mrf.mxu2 }
 0xee4   :  { %v653_v44 = vadd.f32 %v650_v43, %v222_v42 }
 0xee6   :  { %885 = vtanh.f32 %v653_v44  ;;  %v813_v46 = vmul.f32 -1.442695, %v653_v44 }
 0xee8   :  { %887 = vpow2.f32 %v813_v46 }
 0xeec   :  { %v886_v45 = vpop.eup %885 }
 0xeed   :  { %676 = vrot.lane.b32.xlu2 %v886_v45, %s929_s30 }
 0xeee   :  { %v888_v47 = vpop.eup %887 }
 0xeef   :  { %v657_v48 = vadd.f32 1.0, %v888_v47 }
 0xef1   :  { %889 = vrcp.f32 %v657_v48  ;;  %v669_v54 = vand.u32 2147483648, %v657_v48  ;;  %vm663_vm6 = vweird.f32 %v657_v48  ;;  %v667_v37 = vand.u32 2147483647, %v657_v48 }
 0xef3   :  { %v670_v56 = vor.u32 1.1754944e-38, %v669_v54  ;;  %vm668_vm8 = vcmp.eq.f32.partialorder %v667_v37, 8.507059e+37 }
 0xef7   :  { %v890_v49 = vpop.eup %889 }
 0xef8   :  { %v659_v50 = vmul.f32 %v890_v49, %v657_v48  ;;  %vm664_vm5 = vweird.f32 %v890_v49 }
 0xef9   :  { %vm665_vm7 = vmor %vm663_vm6, %vm664_vm5 }
 0xefa   :  { %v660_v51 = vsub.f32 1.0, %v659_v50 }
 0xefc   :  { %v661_v52 = vmul.f32 %v890_v49, %v660_v51 }
 0xefe   :  { %v662_v53 = vadd.f32 %v890_v49, %v661_v52 }
 0xf00   :  { %v666_v55 = vsel %vm665_vm7, %v890_v49, %v662_v53 }
 0xf01   :  { %v671_v58 = vsel %vm668_vm8, %v670_v56, %v666_v55 }
 0xf02   :  { %v674_v60 = vmul.f32 %v671_v58, %v619_v34 }
 0xf47   :  { %v677_v57 = vpop.permute.xlu2 %676 }
 0xf48   :  { %v679_v59 = vmul.f32 %v677_v57, %v671_v58 }
 0xf4a   :  { %681 = vrot.lane.b32.xlu0 %v679_v59, %s930_s4 }
 0xfbc   :  { %v682_v61 = vpop.permute.xlu0 %681 }
 0xfbd   :  { %v684_v62 = vadd.f32 %v682_v61, %v674_v60 }
 0xfbf   :  { %891 = vtanh.f32 %v684_v62 }
 0xfc5   :  { %v892_v63 = vpop.eup %891 }
 0xfc6   :  { %687 = vrot.lane.b32.xlu1 %v892_v63, %s929_s30 }
0x1038   :  { %v688_v0 = vpop.permute.xlu1 %687 }
0x1039   :  { %v690_v1 = vmul.f32 %v688_v0, %v671_v58 }
0x103b   :  { %694 = vrot.lane.b32.xlu2 %v690_v1, %s930_s4 }
0x1095   :  { %v695_v2 = vpop.permute.xlu2 %694 }
0x1096   :  { %814 = vmatmul.msk.f32.vlgmr.msra.gmra.mxu3 %vm33_vm0, %v695_v2 }
0x1119   :  { %v715_v4 = vpop.f32.mrf.mxu3 }
0x111a   :  { %v718_v5 = vadd.f32 %v715_v4, %v225_v3 }
0x111c   :  { %893 = vtanh.f32 %v718_v5  ;;  %v815_v7 = vmul.f32 -1.442695, %v718_v5 }
0x111e   :  { %895 = vpow2.f32 %v815_v7 }
0x1122   :  { %v894_v6 = vpop.eup %893 }
0x1123   :  { %741 = vrot.lane.b32.xlu0 %v894_v6, %s929_s30 }
0x1124   :  { %v896_v8 = vpop.eup %895 }
0x1125   :  { %v722_v9 = vadd.f32 1.0, %v896_v8 }
0x1127   :  { %897 = vrcp.f32 %v722_v9  ;;  %v734_v15 = vand.u32 2147483648, %v722_v9  ;;  %vm728_vm10 = vweird.f32 %v722_v9  ;;  %v732_v38 = vand.u32 2147483647, %v722_v9 }
0x1129   :  { %v735_v29 = vor.u32 1.1754944e-38, %v734_v15  ;;  %vm733_vm12 = vcmp.eq.f32.partialorder %v732_v38, 8.507059e+37 }
0x112d   :  { %v898_v10 = vpop.eup %897 }
0x112e   :  { %v724_v11 = vmul.f32 %v898_v10, %v722_v9  ;;  %vm729_vm9 = vweird.f32 %v898_v10 }
0x112f   :  { %vm730_vm11 = vmor %vm728_vm10, %vm729_vm9 }
0x1130   :  { %v725_v12 = vsub.f32 1.0, %v724_v11 }
0x1132   :  { %v726_v13 = vmul.f32 %v898_v10, %v725_v12 }
0x1134   :  { %v727_v14 = vadd.f32 %v898_v10, %v726_v13 }
0x1136   :  { %v731_v40 = vsel %vm730_vm11, %v898_v10, %v727_v14 }
0x1137   :  { %v736_v16 = vsel %vm733_vm12, %v735_v29, %v731_v40 }
0x1138   :  { %v739_v18 = vmul.f32 %v736_v16, %v684_v62 }
0x1195   :  { %v742_v32 = vpop.permute.xlu0 %741 }
0x1196   :  { %v744_v17 = vmul.f32 %v742_v32, %v736_v16 }
0x1198   :  { %746 = vrot.lane.b32.xlu1 %v744_v17, %s930_s4 }
0x120a   :  { %v747_v21 = vpop.permute.xlu1 %746 }
0x120b   :  { %v749_v23 = vadd.f32 %v747_v21, %v739_v18 }
0x120d   :  { %899 = vtanh.f32 %v749_v23 }
0x1213   :  { %v900_v19 = vpop.eup %899 }
0x1214   :  { %752 = vrot.lane.b32.xlu2 %v900_v19, %s929_s30 }
0x126e   :  { %v753_v24 = vpop.permute.xlu2 %752 }
0x126f   :  { %v755_v20 = vmul.f32 %v753_v24, %v736_v16 }
0x1271   :  { %757 = vrot.lane.b32.xlu0 %v755_v20, %s930_s4 }
0x12e3   :  { %v758_v26 = vpop.permute.xlu0 %757 }
0x12e4   :  { %760 = vst.msk [vmem:[#allocation3] sm:$0xff] %vm33_vm0, %v758_v26 }
0x12e5   :  { %771 = dma.vmem_to_hbm [thread:$0]  %s767_s15, 128, %s769_s18, [#allocation4]  }
0x12e6   :  { %925 = dma.done.wait [#allocation4], 128  }
0x12e7   :  { %926 = vsyncadd [#allocation4], 4294967168 }
0x12e8   :  { %776 = vsyncpa [#allocation4], 1 }

</bundles_post_ra>
